<compile_context>
chip_gen: v7x
topology: tpu7x:2x2x1
jax: 0.10.0
libtpu: 0.0.40
codegen_flags: <defaults>
</compile_context>

<pallas_src>
import functools

import jax
import jax.numpy as jnp
from jax import lax
from jax.experimental import pallas as pl
from jax.experimental.pallas import tpu as pltpu

HIDDEN = 32         # conv_layer_size == lstm_layer_size == 32 in the torch module
OUT_PAD = 128       # lane-dense padding for the two head outputs
NEG_BIG = -1e30
MAX_EDGE_TILE = 4096
EDGE_TILE_GRANULE = 256   # multiple of 256 for v6e/v7x MXU (also fine on v5e)

# ---- wmat_slab column offsets (all rows = HIDDEN, all offsets 128-aligned) ----
WIH_OFF = 0                        # LSTM W_ih^T          (H, 4H)
WHH_OFF = WIH_OFF + 4 * HIDDEN     # LSTM W_hh^T          (H, 4H)
H1_OFF = WHH_OFF + 4 * HIDDEN      # fused [gate_nn l1 | node head]  (H, 2*OUT_PAD)
FG_OFF = H1_OFF + 2 * OUT_PAD      # graph head           (H, OUT_PAD)
ROOT_OFF = FG_OFF + OUT_PAD        # NNConv root, zero-padded to (H, H)
WMAT_COLS = ROOT_OFF + HIDDEN      # 672

# ---- row_slab column offsets (single (1, ROWS_COLS) row, 128-aligned) ---------
CB_OFF = 0          # NNConv bias                      (width H)
LB_OFF = 128        # LSTM bias b_ih + b_hh            (width 4H)
HSW_OFF = 256       # lstm_h_s weight row              (width H)
HSB_OFF = 384       # lstm_h_s bias                    (width H)
CSW_OFF = 512       # lstm_c_s weight row              (width H)
CSB_OFF = 640       # lstm_c_s bias                    (width H)
H1B_OFF = 768       # fused [gate_nn l1 bias | node head bias]  (width 2*OUT_PAD)
G2W_OFF = H1B_OFF + 2 * OUT_PAD    # gate_nn layer-2 weight row  (width OUT_PAD)
G2B_OFF = G2W_OFF + OUT_PAD        # gate_nn layer-2 bias        (scalar)
FGB_OFF = G2B_OFF + 128            # graph head bias             (width OUT_PAD)
ROWS_COLS = FGB_OFF + OUT_PAD      # 1408


def _gmax(a):
  return jnp.max(jnp.max(a, axis=1, keepdims=True), axis=0, keepdims=True)


def _gsum(a):
  return jnp.sum(jnp.sum(a, axis=1, keepdims=True), axis=0, keepdims=True)


def recur_graph_agent_kernel(
    # edge-tiled inputs
    tgt_ref, kron_ref,
    # consolidated resident inputs
    aaug_ref, node_ref, wmat_ref, rows_ref,
    # outputs (lane-dense padded)
    node_out_ref, graph_out_ref,
    # scratch
    aggr_ref,
    *, num_nodes, num_graphs, hidden, edge_dtype):
  f32 = jnp.float32
  k = pl.program_id(0)

  @pl.when(k == 0)
  def _():
    aggr_ref[...] = jnp.zeros_like(aggr_ref)

  # ---- NNConv messages for this edge tile: single MXU matmul ----------------
  # kron rows for padded edges are exactly zero (built in the wrapper), so the
  # folded conv_lin bias cannot leak into real target nodes.
  msgs = jnp.dot(kron_ref[...], aaug_ref[...],
                 preferred_element_type=f32)                # (Et, H)

  # ---- scatter-add to target nodes via one-hot matmul -----------------------
  e_tile = tgt_ref.shape[1]
  tgt = tgt_ref[...]                                        # (1, Et) int32
  node_iota = lax.broadcasted_iota(jnp.int32, (num_nodes, e_tile), 0)
  tgt_mask = (node_iota == tgt).astype(f32).astype(edge_dtype)   # (N, Et)
  aggr_ref[...] += jnp.dot(tgt_mask, msgs.astype(edge_dtype),
                           preferred_element_type=f32)

  # ---- tail: LSTM step + attention pool + heads (last edge tile only) -------
  @pl.when(k == pl.num_programs(0) - 1)
  def _():
    hh = hidden
    nd = node_ref[...]                                      # (N, H + 2) f32
    x_pad = nd[:, 0:hh]                                     # x zero-padded to H cols
    init = nd[:, hh:hh + 1]                                 # (N, 1)
    batch = nd[:, hh + 1:hh + 2].astype(jnp.int32)          # (N, 1)

    conv = (aggr_ref[...]
            + jnp.dot(x_pad, wmat_ref[:, ROOT_OFF:ROOT_OFF + hh],
                      preferred_element_type=f32)
            + rows_ref[:, CB_OFF:CB_OFF + hh])
    graph_step = jnp.maximum(conv, 0.0)                     # relu, (N, H)

    # single-step LSTM; h0/c0 = Linear(initial); dropout inactive (1 layer)
    h0 = init * rows_ref[:, HSW_OFF:HSW_OFF + hh] + rows_ref[:, HSB_OFF:HSB_OFF + hh]
    c0 = init * rows_ref[:, CSW_OFF:CSW_OFF + hh] + rows_ref[:, CSB_OFF:CSB_OFF + hh]
    gates = (jnp.dot(graph_step, wmat_ref[:, WIH_OFF:WIH_OFF + 4 * hh],
                     preferred_element_type=f32)
             + jnp.dot(h0, wmat_ref[:, WHH_OFF:WHH_OFF + 4 * hh],
                       preferred_element_type=f32)
             + rows_ref[:, LB_OFF:LB_OFF + 4 * hh])         # (N, 4H): i,f,g,o
    i_g = jax.nn.sigmoid(gates[:, 0:hh])
    f_g = jax.nn.sigmoid(gates[:, hh:2 * hh])
    g_g = jnp.tanh(gates[:, 2 * hh:3 * hh])
    o_g = jax.nn.sigmoid(gates[:, 3 * hh:4 * hh])
    c1 = f_g * c0 + i_g * g_g
    h1 = o_g * jnp.tanh(c1)                                 # lstm_output[-1]

    # fused h1 matmul: [gate_nn layer-1 (padded to 128) | node head (padded)]
    hcat = (jnp.dot(h1, wmat_ref[:, H1_OFF:H1_OFF + 2 * OUT_PAD],
                    preferred_element_type=f32)
            + rows_ref[:, H1B_OFF:H1B_OFF + 2 * OUT_PAD])
    gate_h = jnp.maximum(hcat[:, 0:OUT_PAD], 0.0)           # (N, 128)
    fn = hcat[:, OUT_PAD:2 * OUT_PAD]                       # padded node logits

    gate = (jnp.sum(gate_h * rows_ref[:, G2W_OFF:G2W_OFF + OUT_PAD],
                    axis=1, keepdims=True)
            + rows_ref[:, G2B_OFF:G2B_OFF + 1])             # (N, 1)

    # GlobalAttention pool: segment softmax of gate over each graph.
    member = (lax.broadcasted_iota(jnp.int32, (num_nodes, num_graphs), 1)
              == batch).astype(f32)                         # (N, G)
    masked = gate * member + (member - 1.0) * 1e30          # -1e30 off-segment
    max_g = jnp.max(masked, axis=0, keepdims=True)          # (1, G)
    node_max = jnp.sum(member * max_g, axis=1, keepdims=True)
    alpha = jnp.exp(gate - node_max)
    denom_g = jnp.sum(member * alpha, axis=0, keepdims=True)
    node_den = jnp.sum(member * denom_g, axis=1, keepdims=True)
    attn = alpha / node_den
    pooled = lax.dot_general(member, attn * h1, (((0,), (0,)), ((), ())),
                             preferred_element_type=f32)    # (G, H)

    # heads + softmax over flattened outputs (padded logits are -1e30 -> exp=0)
    fg = (jnp.dot(pooled, wmat_ref[:, FG_OFF:FG_OFF + OUT_PAD],
                  preferred_element_type=f32)
          + rows_ref[:, FGB_OFF:FGB_OFF + OUT_PAD])
    fn_e = jnp.exp(fn - _gmax(fn))
    node_out_ref[...] = fn_e / _gsum(fn_e)
    fg_e = jnp.exp(fg - _gmax(fg))
    graph_out_ref[...] = fg_e / _gsum(fg_e)


def _vmem_capacity_bytes():
  try:
    return int(getattr(pltpu.get_tpu_info(), "vmem_capacity_bytes"))
  except Exception:
    return 64 * 1024 * 1024   # conservative (v7x per-TC VMEM)


def _auto_edge_config(num_edges, num_nodes, kron_cols, edge_itemsize):
  """Pick (edge_tile, vmem_limit_bytes) for the current TPU generation."""
  vmem_cap = _vmem_capacity_bytes()
  # <= 3/4 of physical, capped at 96 MiB (v5e/v6e: 128 MiB -> 96; v7x: 64 -> 48).
  vmem_limit = min((vmem_cap * 3) // 4, 96 * 1024 * 1024)
  # per-edge VMEM bytes: double-buffered kron tile + tgt ids + in-kernel
  # one-hot mask + message rows, plus slack.
  per_edge = (2 * kron_cols * edge_itemsize + 2 * 4
              + num_nodes * edge_itemsize + HIDDEN * 4 + 64)
  budget = max(vmem_limit // 2, per_edge * EDGE_TILE_GRANULE)
  tile = (budget // per_edge) // EDGE_TILE_GRANULE * EDGE_TILE_GRANULE
  tile = max(EDGE_TILE_GRANULE, min(tile, MAX_EDGE_TILE))
  # do not over-pad small graphs
  tile = min(tile, pl.cdiv(max(num_edges, 1), EDGE_TILE_GRANULE) * EDGE_TILE_GRANULE)
  return tile, vmem_limit


def recur_graph_agent_forward(x, edge_index, edge_attr, batch, initial, params,
                              *, num_graphs, edge_tile=None,
                              edge_dtype=jnp.bfloat16):
  n, f_node = x.shape
  e = edge_index.shape[1]
  f_edge = edge_attr.shape[1]
  h = HIDDEN
  node_out = params['fn_w'].shape[0]
  graph_out = params['fg_w'].shape[0]
  fe1 = f_edge + 1
  kron_cols = f_node * fe1
  if f_node > h:
    # TODO(synk): F_node > 32 would need root in its own slab; not supported here.
    raise NotImplementedError("recur_graph_agent_forward assumes F_node <= 32")

  auto_tile, vmem_limit = _auto_edge_config(
      e, n, kron_cols, jnp.dtype(edge_dtype).itemsize)
  if edge_tile is None:
    edge_tile = auto_tile
  e_pad = pl.cdiv(e, edge_tile) * edge_tile

  x32 = x.astype(jnp.float32)
  src = edge_index[0].astype(jnp.int32)
  tgt = edge_index[1].astype(jnp.int32)

  # ---- precomputed per-edge kron tensor: kron[e] = x[src[e]] (x) [edge_attr[e], 1]
  # Padded rows are exactly zero (no conv_lin bias leak); padded targets = n
  # (never matches the node iota in the kernel).
  ea_aug = jnp.concatenate(
      [edge_attr.astype(jnp.float32), jnp.ones((e, 1), jnp.float32)], axis=1)
  kron_valid = (x32[src][:, :, None] * ea_aug[:, None, :]).reshape(e, kron_cols)
  kron_pad = jnp.zeros((e_pad, kron_cols), edge_dtype).at[:e].set(
      kron_valid.astype(edge_dtype))
  tgt_pad = jnp.full((1, e_pad), n, jnp.int32).at[0, :e].set(tgt)

  # ---- fold conv_lin weight+bias so  msgs = kron @ a_aug
  cl_w = params['cl_w']                                      # (F*H, Fe)
  cl_b = params['cl_b']                                      # (F*H,)
  w3 = cl_w.reshape(f_node, h, f_edge).transpose(0, 2, 1)    # (F, Fe, H)
  b3 = cl_b.reshape(f_node, h)[:, None, :]                   # (F, 1, H)
  a_aug = jnp.concatenate([w3, b3], axis=1).reshape(kron_cols, h).astype(edge_dtype)

  # ---- consolidated resident slabs -----------------------------------------
  # node_data: [x zero-padded to H cols | initial | batch(f32)]
  node_data = jnp.zeros((n, h + 2), jnp.float32)
  node_data = node_data.at[:, :f_node].set(x32)
  node_data = node_data.at[:, h].set(initial.astype(jnp.float32)[:, 0])
  node_data = node_data.at[:, h + 1].set(batch.astype(jnp.float32))

  # wmat_slab: every H-row matrix, columns lane-aligned
  wm = jnp.zeros((h, WMAT_COLS), jnp.float32)
  wm = wm.at[:, WIH_OFF:WIH_OFF + 4 * h].set(params['w_ih'].T)
  wm = wm.at[:, WHH_OFF:WHH_OFF + 4 * h].set(params['w_hh'].T)
  wm = wm.at[:, H1_OFF:H1_OFF + 2 * h].set(params['g1_w'].T)            # gate_nn l1
  wm = wm.at[:, H1_OFF + OUT_PAD:H1_OFF + OUT_PAD + node_out].set(params['fn_w'].T)
  wm = wm.at[:, FG_OFF:FG_OFF + graph_out].set(params['fg_w'].T)
  wm = wm.at[:f_node, ROOT_OFF:ROOT_OFF + h].set(params['root'])

  # row_slab: every bias / row-vector, 128-aligned segments.  Head-bias padding
  # is NEG_BIG so the in-kernel softmax over padded logits stays exact.
  rs = jnp.zeros((1, ROWS_COLS), jnp.float32)
  rs = rs.at[0, CB_OFF:CB_OFF + h].set(params['c_b'])
  rs = rs.at[0, LB_OFF:LB_OFF + 4 * h].set(params['b_ih'] + params['b_hh'])
  rs = rs.at[0, HSW_OFF:HSW_OFF + h].set(params['hs_w'][:, 0])
  rs = rs.at[0, HSB_OFF:HSB_OFF + h].set(params['hs_b'])
  rs = rs.at[0, CSW_OFF:CSW_OFF + h].set(params['cs_w'][:, 0])
  rs = rs.at[0, CSB_OFF:CSB_OFF + h].set(params['cs_b'])
  rs = rs.at[0, H1B_OFF:H1B_OFF + 2 * h].set(params['g1_b'])
  rs = rs.at[0, H1B_OFF + OUT_PAD:H1B_OFF + 2 * OUT_PAD].set(NEG_BIG)
  rs = rs.at[0, H1B_OFF + OUT_PAD:H1B_OFF + OUT_PAD + node_out].set(params['fn_b'])
  rs = rs.at[0, G2W_OFF:G2W_OFF + 2 * h].set(params['g2_w'][0])
  rs = rs.at[0, G2B_OFF].set(params['g2_b'][0])
  rs = rs.at[0, FGB_OFF:FGB_OFF + OUT_PAD].set(NEG_BIG)
  rs = rs.at[0, FGB_OFF:FGB_OFF + graph_out].set(params['fg_b'])

  edge_args = (tgt_pad, kron_pad)
  resident_args = (a_aug, node_data, wm, rs)

  in_specs = [
      pl.BlockSpec((1, edge_tile), lambda k: (0, k)),             # target ids tile
      pl.BlockSpec((edge_tile, kron_cols), lambda k: (k, 0)),     # kron tile
  ] + [pl.BlockSpec(a.shape, lambda k: (0, 0)) for a in resident_args]

  out_specs = (pl.BlockSpec((n, OUT_PAD), lambda k: (0, 0)),
               pl.BlockSpec((num_graphs, OUT_PAD), lambda k: (0, 0)))

  kernel = functools.partial(
      recur_graph_agent_kernel, num_nodes=n, num_graphs=num_graphs, hidden=h,
      edge_dtype=edge_dtype)

  flops = int(
      2 * e_pad * kron_cols * h                   # messages: kron @ a_aug
      + 2 * n * e_pad * h                         # one-hot scatter matmul
      + 2 * n * (h * h + 2 * h * 4 * h + h * 2 * OUT_PAD)
      + 2 * num_graphs * (n * h + h * OUT_PAD))
  transcendentals = int(n * (5 * h + OUT_PAD + 1) + num_graphs * OUT_PAD)
  bytes_accessed = int(
      sum(int(a.size) * a.dtype.itemsize for a in edge_args + resident_args)
      + (n + num_graphs) * OUT_PAD * 4)

  node_pad, graph_pad = pl.pallas_call(
      kernel,
      out_shape=(jax.ShapeDtypeStruct((n, OUT_PAD), jnp.float32),
                 jax.ShapeDtypeStruct((num_graphs, OUT_PAD), jnp.float32)),
      grid=(e_pad // edge_tile,),
      in_specs=in_specs,
      out_specs=out_specs,
      scratch_shapes=[pltpu.VMEM((n, h), jnp.float32)],        # aggr accumulator
      compiler_params=pltpu.CompilerParams(
          dimension_semantics=("arbitrary",),                  # edge reduction axis
          vmem_limit_bytes=int(vmem_limit)),
      cost_estimate=pl.CostEstimate(flops=flops, transcendentals=transcendentals,
                                    bytes_accessed=bytes_accessed),
  )(*edge_args, *resident_args)

  # slice the lane-dense padding away; matches .view(-1) + softmax on the torch side
  return (node_pad[:, :node_out].reshape(-1),
          graph_pad[:, :graph_out].reshape(-1))


def init_params(key, f_node, f_edge, node_out, graph_out, hidden=HIDDEN):
  ks = iter(jax.random.split(key, 24))

  def w(shape, scale=0.1):
    return (scale * jax.random.normal(next(ks), shape)).astype(jnp.float32)

  return dict(
      cl_w=w((f_node * hidden, f_edge)), cl_b=w((f_node * hidden,)),   # conv_lin
      root=w((f_node, hidden)), c_b=w((hidden,)),                      # NNConv root/bias
      w_ih=w((4 * hidden, hidden)), w_hh=w((4 * hidden, hidden)),      # LSTM
      b_ih=w((4 * hidden,)), b_hh=w((4 * hidden,)),
      hs_w=w((hidden, 1)), hs_b=w((hidden,)),                          # lstm_h_s
      cs_w=w((hidden, 1)), cs_b=w((hidden,)),                          # lstm_c_s
      g1_w=w((2 * hidden, hidden)), g1_b=w((2 * hidden,)),             # gate_nn
      g2_w=w((1, 2 * hidden)), g2_b=w((1,)),
      fg_w=w((graph_out, hidden)), fg_b=w((graph_out,)),               # final_graph_linear
      fn_w=w((node_out, hidden)), fn_b=w((node_out,)),                 # final_node_linear
  )


def reference_forward(x, edge_index, edge_attr, batch, initial, p, *, num_graphs):
  """Plain-JAX reference of the same forward pass (for correctness check)."""
  n, f_node = x.shape
  h = HIDDEN
  src, tgt = edge_index[0], edge_index[1]
  edge_w = edge_attr @ p['cl_w'].T + p['cl_b']
  w_e = edge_w.reshape(-1, f_node, h)
  msgs = jnp.einsum('ef,efh->eh', x[src], w_e)
  aggr = jnp.zeros((n, h), jnp.float32).at[tgt].add(msgs)
  graph_step = jax.nn.relu(aggr + x @ p['root'] + p['c_b'])
  h0 = initial @ p['hs_w'].T + p['hs_b']
  c0 = initial @ p['cs_w'].T + p['cs_b']
  gates = graph_step @ p['w_ih'].T + p['b_ih'] + h0 @ p['w_hh'].T + p['b_hh']
  i_g, f_g, g_g, o_g = jnp.split(gates, 4, axis=1)
  c1 = jax.nn.sigmoid(f_g) * c0 + jax.nn.sigmoid(i_g) * jnp.tanh(g_g)
  h1 = jax.nn.sigmoid(o_g) * jnp.tanh(c1)
  gate = jax.nn.relu(h1 @ p['g1_w'].T + p['g1_b']) @ p['g2_w'].T + p['g2_b']
  seg_max = jnp.full((num_graphs, 1), -1e30, jnp.float32).at[batch].max(gate)
  alpha = jnp.exp(gate - seg_max[batch])
  denom = jnp.zeros((num_graphs, 1), jnp.float32).at[batch].add(alpha)
  attn = alpha / denom[batch]
  pooled = jnp.zeros((num_graphs, h), jnp.float32).at[batch].add(attn * h1)
  fg = pooled @ p['fg_w'].T + p['fg_b']
  fn = h1 @ p['fn_w'].T + p['fn_b']
  return jax.nn.softmax(fn.reshape(-1)), jax.nn.softmax(fg.reshape(-1))


if __name__ == "__main__":
  key = jax.random.PRNGKey(0)
  k_x, k_ei, k_ea, k_init, k_p = jax.random.split(key, 5)

  N, E, F_NODE, F_EDGE = 8, 200, 4, 6
  NODE_OUT, GRAPH_OUT, NUM_GRAPHS = 3, 5, 2

  x = jax.random.normal(k_x, (N, F_NODE), jnp.float32)
  edge_index = jax.random.randint(k_ei, (2, E), 0, N, jnp.int32)
  edge_attr = jax.random.normal(k_ea, (E, F_EDGE), jnp.float32)
  batch = jnp.concatenate([jnp.zeros((N // 2,), jnp.int32),
                           jnp.ones((N - N // 2,), jnp.int32)])
  initial = jax.random.normal(k_init, (N, 1), jnp.float32)
  params = init_params(k_p, F_NODE, F_EDGE, NODE_OUT, GRAPH_OUT)

  ref_node, ref_graph = reference_forward(
      x, edge_index, edge_attr, batch, initial, params, num_graphs=NUM_GRAPHS)

  # 1) bit-faithful f32 path with a forced small edge tile (E=200 -> 2 tiles),
  #    exercising the multi-tile accumulator grid; strict tolerance.
  node_sm, graph_sm = recur_graph_agent_forward(
      x, edge_index, edge_attr, batch, initial, params,
      num_graphs=NUM_GRAPHS, edge_tile=128, edge_dtype=jnp.float32)
  jax.block_until_ready((node_sm, graph_sm))
  assert node_sm.shape == (N * NODE_OUT,)
  assert graph_sm.shape == (NUM_GRAPHS * GRAPH_OUT,)
  assert jnp.allclose(node_sm, ref_node, atol=1e-5, rtol=1e-5)
  assert jnp.allclose(graph_sm, ref_graph, atol=1e-5, rtol=1e-5)

  # 2) default fast path: per-generation auto edge tile + bf16 edge matmuls
  #    (f32 accumulation); looser tolerance for the bf16 message path.
  node_bf, graph_bf = recur_graph_agent_forward(
      x, edge_index, edge_attr, batch, initial, params, num_graphs=NUM_GRAPHS)
  jax.block_until_ready((node_bf, graph_bf))
  assert jnp.allclose(node_bf, ref_node, atol=2e-2)
  assert jnp.allclose(graph_bf, ref_graph, atol=2e-2)
  assert abs(float(jnp.sum(node_bf)) - 1.0) < 1e-2
  assert abs(float(jnp.sum(graph_bf)) - 1.0) < 1e-2

  print("KERNEL_OK")
</pallas_src>

<mosaic_0001>
module attributes {stable_mosaic.version = 11 : i64} {
  func.func @recur_graph_agent_kernel(%arg0: i32, %arg1: memref<1x128xi32, #tpu.memory_space<vmem>>, %arg2: memref<128x28xf32, #tpu.memory_space<vmem>>, %arg3: memref<28x32xf32, #tpu.memory_space<vmem>>, %arg4: memref<8x34xf32, #tpu.memory_space<vmem>>, %arg5: memref<32x672xf32, #tpu.memory_space<vmem>>, %arg6: memref<1x1408xf32, #tpu.memory_space<vmem>>, %arg7: memref<8x128xf32, #tpu.memory_space<vmem>>, %arg8: memref<2x128xf32, #tpu.memory_space<vmem>>, %arg9: memref<8x32xf32, #tpu.memory_space<vmem>>) attributes {dimension_semantics = [#tpu.dimension_semantics<arbitrary>], iteration_bounds = array<i64: 2>, scalar_prefetch = 0 : i64, scratch_operands = 1 : i64, tpu.core_type = #tpu.core_type<tc>, window_params = [{transform_indices = @transform_0, window_bounds = array<i64: 1, 128>}, {transform_indices = @transform_1, window_bounds = array<i64: 128, 28>}, {pipeline_mode = #tpu.pipeline_mode<synchronous>, transform_indices = @transform_2, window_bounds = array<i64: 28, 32>}, {pipeline_mode = #tpu.pipeline_mode<synchronous>, transform_indices = @transform_3, window_bounds = array<i64: 8, 34>}, {pipeline_mode = #tpu.pipeline_mode<synchronous>, transform_indices = @transform_4, window_bounds = array<i64: 32, 672>}, {pipeline_mode = #tpu.pipeline_mode<synchronous>, transform_indices = @transform_5, window_bounds = array<i64: 1, 1408>}, {pipeline_mode = #tpu.pipeline_mode<synchronous>, transform_indices = @transform_6, window_bounds = array<i64: 8, 128>}, {pipeline_mode = #tpu.pipeline_mode<synchronous>, transform_indices = @transform_7, window_bounds = array<i64: 2, 128>}]} {
    %c0_i32 = arith.constant 0 : i32
    %0 = arith.cmpi eq, %arg0, %c0_i32 : i32
    %1 = arith.extui %0 : i1 to i32
    %c0_i32_0 = arith.constant 0 : i32
    %2 = arith.cmpi ne, %1, %c0_i32_0 : i32
    scf.if %2 {
      %cst_12 = arith.constant 0.000000e+00 : f32
      %19 = vector.broadcast %cst_12 : f32 to vector<8x32xf32>
      %c0_13 = arith.constant 0 : index
      %c0_14 = arith.constant 0 : index
      %20 = vector.load %arg9[%c0_13, %c0_14] : memref<8x32xf32, #tpu.memory_space<vmem>>, vector<8x32xf32>
      tpu.vector_store %arg9[%c0_13, %c0_14], %19 {strides = array<i32>} : memref<8x32xf32, #tpu.memory_space<vmem>>, vector<8x32xf32>,
    } else {
    }
    %c0 = arith.constant 0 : index
    %c0_1 = arith.constant 0 : index
    %3 = vector.load %arg2[%c0, %c0_1] : memref<128x28xf32, #tpu.memory_space<vmem>>, vector<128x28xf32>
    %c0_2 = arith.constant 0 : index
    %c0_3 = arith.constant 0 : index
    %4 = vector.load %arg3[%c0_2, %c0_3] : memref<28x32xf32, #tpu.memory_space<vmem>>, vector<28x32xf32>
    %cst = arith.constant dense<0.000000e+00> : vector<128x32xf32>
    %5 = tpu.matmul %3, %4, %cst {dimension_numbers = #tpu.dot_dimension_numbers<[1], [0], [0], [1], [0, 0, 1, 1], [], []>} : vector<128x28xf32>, vector<28x32xf32>, vector<128x32xf32> -> vector<128x32xf32>
    %c0_4 = arith.constant 0 : index
    %c0_5 = arith.constant 0 : index
    %6 = vector.load %arg1[%c0_4, %c0_5] : memref<1x128xi32, #tpu.memory_space<vmem>>, vector<1x128xi32>
    %7 = tpu.iota {dimensions = array<i32: 0>} : vector<8x128xi32>
    %8 = vector.broadcast %6 : vector<1x128xi32> to vector<8x128xi32>
    %9 = arith.cmpi eq, %7, %8 : vector<8x128xi32>
    %10 = arith.extui %9 : vector<8x128xi1> to vector<8x128xi32>
    %11 = arith.sitofp %10 : vector<8x128xi32> to vector<8x128xf32>
    %c0_6 = arith.constant 0 : index
    %c0_7 = arith.constant 0 : index
    %12 = vector.load %arg9[%c0_6, %c0_7] : memref<8x32xf32, #tpu.memory_space<vmem>>, vector<8x32xf32>
    %cst_8 = arith.constant dense<0.000000e+00> : vector<8x32xf32>
    %13 = tpu.matmul %11, %5, %cst_8 {dimension_numbers = #tpu.dot_dimension_numbers<[1], [0], [0], [1], [0, 0, 1, 1], [], []>} : vector<8x128xf32>, vector<128x32xf32>, vector<8x32xf32> -> vector<8x32xf32>
    %14 = arith.addf %12, %13 : vector<8x32xf32>
    %c0_9 = arith.constant 0 : index
    %c0_10 = arith.constant 0 : index
    %15 = vector.load %arg9[%c0_9, %c0_10] : memref<8x32xf32, #tpu.memory_space<vmem>>, vector<8x32xf32>
    tpu.vector_store %arg9[%c0_9, %c0_10], %14 {strides = array<i32>} : memref<8x32xf32, #tpu.memory_space<vmem>>, vector<8x32xf32>,
    %c1_i32 = arith.constant 1 : i32
    %16 = arith.cmpi eq, %arg0, %c1_i32 : i32
    %17 = arith.extui %16 : i1 to i32
    %c0_i32_11 = arith.constant 0 : i32
    %18 = arith.cmpi ne, %17, %c0_i32_11 : i32
    scf.if %18 {
      %c0_12 = arith.constant 0 : index
      %c0_13 = arith.constant 0 : index
      %19 = vector.load %arg4[%c0_12, %c0_13] : memref<8x34xf32, #tpu.memory_space<vmem>>, vector<8x34xf32>
      %20 = vector.extract_strided_slice %19 {offsets = [0, 0], sizes = [8, 32], strides = [1, 1]} : vector<8x34xf32> to vector<8x32xf32>
      %21 = vector.extract_strided_slice %19 {offsets = [0, 32], sizes = [8, 1], strides = [1, 1]} : vector<8x34xf32> to vector<8x1xf32>
      %22 = vector.extract_strided_slice %19 {offsets = [0, 33], sizes = [8, 1], strides = [1, 1]} : vector<8x34xf32> to vector<8x1xf32>
      %23 = arith.fptosi %22 : vector<8x1xf32> to vector<8x1xi32>
      %c0_14 = arith.constant 0 : index
      %c0_15 = arith.constant 0 : index
      %24 = vector.load %arg9[%c0_14, %c0_15] : memref<8x32xf32, #tpu.memory_space<vmem>>, vector<8x32xf32>
      %c0_16 = arith.constant 0 : index
      %c640 = arith.constant 640 : index
      %25 = vector.load %arg5[%c0_16, %c640] : memref<32x672xf32, #tpu.memory_space<vmem>>, vector<32x32xf32>
      %cst_17 = arith.constant dense<0.000000e+00> : vector<8x32xf32>
      %26 = tpu.matmul %20, %25, %cst_17 {dimension_numbers = #tpu.dot_dimension_numbers<[1], [0], [0], [1], [0, 0, 1, 1], [], []>} : vector<8x32xf32>, vector<32x32xf32>, vector<8x32xf32> -> vector<8x32xf32>
      %27 = arith.addf %24, %26 : vector<8x32xf32>
      %c0_18 = arith.constant 0 : index
      %c0_19 = arith.constant 0 : index
      %28 = vector.load %arg6[%c0_18, %c0_19] : memref<1x1408xf32, #tpu.memory_space<vmem>>, vector<1x32xf32>
      %29 = vector.broadcast %28 : vector<1x32xf32> to vector<8x32xf32>
      %30 = arith.addf %27, %29 : vector<8x32xf32>
      %cst_20 = arith.constant 0.000000e+00 : f32
      %31 = vector.broadcast %cst_20 : f32 to vector<8x32xf32>
      %32 = arith.maximumf %30, %31 : vector<8x32xf32>
      %c0_21 = arith.constant 0 : index
      %c256 = arith.constant 256 : index
      %33 = vector.load %arg6[%c0_21, %c256] : memref<1x1408xf32, #tpu.memory_space<vmem>>, vector<1x32xf32>
      %34 = vector.broadcast %21 : vector<8x1xf32> to vector<8x32xf32>
      %35 = vector.broadcast %33 : vector<1x32xf32> to vector<8x32xf32>
      %36 = arith.mulf %34, %35 : vector<8x32xf32>
      %c0_22 = arith.constant 0 : index
      %c384 = arith.constant 384 : index
      %37 = vector.load %arg6[%c0_22, %c384] : memref<1x1408xf32, #tpu.memory_space<vmem>>, vector<1x32xf32>
      %38 = vector.broadcast %37 : vector<1x32xf32> to vector<8x32xf32>
      %39 = arith.addf %36, %38 : vector<8x32xf32>
      %c0_23 = arith.constant 0 : index
      %c512 = arith.constant 512 : index
      %40 = vector.load %arg6[%c0_23, %c512] : memref<1x1408xf32, #tpu.memory_space<vmem>>, vector<1x32xf32>
      %41 = vector.broadcast %21 : vector<8x1xf32> to vector<8x32xf32>
      %42 = vector.broadcast %40 : vector<1x32xf32> to vector<8x32xf32>
      %43 = arith.mulf %41, %42 : vector<8x32xf32>
      %c0_24 = arith.constant 0 : index
      %c640_25 = arith.constant 640 : index
      %44 = vector.load %arg6[%c0_24, %c640_25] : memref<1x1408xf32, #tpu.memory_space<vmem>>, vector<1x32xf32>
      %45 = vector.broadcast %44 : vector<1x32xf32> to vector<8x32xf32>
      %46 = arith.addf %43, %45 : vector<8x32xf32>
      %c0_26 = arith.constant 0 : index
      %c0_27 = arith.constant 0 : index
      %47 = vector.load %arg5[%c0_26, %c0_27] : memref<32x672xf32, #tpu.memory_space<vmem>>, vector<32x128xf32>
      %cst_28 = arith.constant dense<0.000000e+00> : vector<8x128xf32>
      %48 = tpu.matmul %32, %47, %cst_28 {dimension_numbers = #tpu.dot_dimension_numbers<[1], [0], [0], [1], [0, 0, 1, 1], [], []>} : vector<8x32xf32>, vector<32x128xf32>, vector<8x128xf32> -> vector<8x128xf32>
      %c0_29 = arith.constant 0 : index
      %c128 = arith.constant 128 : index
      %49 = vector.load %arg5[%c0_29, %c128] : memref<32x672xf32, #tpu.memory_space<vmem>>, vector<32x128xf32>
      %cst_30 = arith.constant dense<0.000000e+00> : vector<8x128xf32>
      %50 = tpu.matmul %39, %49, %cst_30 {dimension_numbers = #tpu.dot_dimension_numbers<[1], [0], [0], [1], [0, 0, 1, 1], [], []>} : vector<8x32xf32>, vector<32x128xf32>, vector<8x128xf32> -> vector<8x128xf32>
      %51 = arith.addf %48, %50 : vector<8x128xf32>
      %c0_31 = arith.constant 0 : index
      %c128_32 = arith.constant 128 : index
      %52 = vector.load %arg6[%c0_31, %c128_32] : memref<1x1408xf32, #tpu.memory_space<vmem>>, vector<1x128xf32>
      %53 = vector.broadcast %52 : vector<1x128xf32> to vector<8x128xf32>
      %54 = arith.addf %51, %53 : vector<8x128xf32>
      %55 = vector.extract_strided_slice %54 {offsets = [0, 0], sizes = [8, 32], strides = [1, 1]} : vector<8x128xf32> to vector<8x32xf32>
      %56 = arith.negf %55 : vector<8x32xf32>
      %57 = math.exp %56 : vector<8x32xf32>
      %cst_33 = arith.constant 1.000000e+00 : f32
      %58 = vector.broadcast %cst_33 : f32 to vector<8x32xf32>
      %59 = arith.addf %58, %57 : vector<8x32xf32>
      %60 = arith.divf %58, %59 : vector<8x32xf32>
      %61 = vector.extract_strided_slice %54 {offsets = [0, 32], sizes = [8, 32], strides = [1, 1]} : vector<8x128xf32> to vector<8x32xf32>
      %62 = arith.negf %61 : vector<8x32xf32>
      %63 = math.exp %62 : vector<8x32xf32>
      %cst_34 = arith.constant 1.000000e+00 : f32
      %64 = vector.broadcast %cst_34 : f32 to vector<8x32xf32>
      %65 = arith.addf %64, %63 : vector<8x32xf32>
      %66 = arith.divf %64, %65 : vector<8x32xf32>
      %67 = vector.extract_strided_slice %54 {offsets = [0, 64], sizes = [8, 32], strides = [1, 1]} : vector<8x128xf32> to vector<8x32xf32>
      %68 = math.tanh %67 : vector<8x32xf32>
      %69 = vector.extract_strided_slice %54 {offsets = [0, 96], sizes = [8, 32], strides = [1, 1]} : vector<8x128xf32> to vector<8x32xf32>
      %70 = arith.negf %69 : vector<8x32xf32>
      %71 = math.exp %70 : vector<8x32xf32>
      %cst_35 = arith.constant 1.000000e+00 : f32
      %72 = vector.broadcast %cst_35 : f32 to vector<8x32xf32>
      %73 = arith.addf %72, %71 : vector<8x32xf32>
      %74 = arith.divf %72, %73 : vector<8x32xf32>
      %75 = arith.mulf %66, %46 : vector<8x32xf32>
      %76 = arith.mulf %60, %68 : vector<8x32xf32>
      %77 = arith.addf %75, %76 : vector<8x32xf32>
      %78 = math.tanh %77 : vector<8x32xf32>
      %79 = arith.mulf %74, %78 : vector<8x32xf32>
      %c0_36 = arith.constant 0 : index
      %c256_37 = arith.constant 256 : index
      %80 = vector.load %arg5[%c0_36, %c256_37] : memref<32x672xf32, #tpu.memory_space<vmem>>, vector<32x256xf32>
      %cst_38 = arith.constant dense<0.000000e+00> : vector<8x256xf32>
      %81 = tpu.matmul %79, %80, %cst_38 {dimension_numbers = #tpu.dot_dimension_numbers<[1], [0], [0], [1], [0, 0, 1, 1], [], []>} : vector<8x32xf32>, vector<32x256xf32>, vector<8x256xf32> -> vector<8x256xf32>
      %c0_39 = arith.constant 0 : index
      %c768 = arith.constant 768 : index
      %82 = vector.load %arg6[%c0_39, %c768] : memref<1x1408xf32, #tpu.memory_space<vmem>>, vector<1x256xf32>
      %83 = vector.broadcast %82 : vector<1x256xf32> to vector<8x256xf32>
      %84 = arith.addf %81, %83 : vector<8x256xf32>
      %85 = vector.extract_strided_slice %84 {offsets = [0, 0], sizes = [8, 128], strides = [1, 1]} : vector<8x256xf32> to vector<8x128xf32>
      %cst_40 = arith.constant 0.000000e+00 : f32
      %86 = vector.broadcast %cst_40 : f32 to vector<8x128xf32>
      %87 = arith.maximumf %85, %86 : vector<8x128xf32>
      %88 = vector.extract_strided_slice %84 {offsets = [0, 128], sizes = [8, 128], strides = [1, 1]} : vector<8x256xf32> to vector<8x128xf32>
      %c0_41 = arith.constant 0 : index
      %c1024 = arith.constant 1024 : index
      %89 = vector.load %arg6[%c0_41, %c1024] : memref<1x1408xf32, #tpu.memory_space<vmem>>, vector<1x128xf32>
      %90 = vector.broadcast %89 : vector<1x128xf32> to vector<8x128xf32>
      %91 = arith.mulf %87, %90 : vector<8x128xf32>
      %cst_42 = arith.constant dense<0.000000e+00> : vector<8xf32>
      %92 = vector.multi_reduction <add>, %91, %cst_42 [1] : vector<8x128xf32> to vector<8xf32>
      %93 = vector.shape_cast %92 : vector<8xf32> to vector<8x1xf32>
      %c0_43 = arith.constant 0 : index
      %c1152 = arith.constant 1152 : index
      %94 = vector.load %arg6[%c0_43, %c1152] : memref<1x1408xf32, #tpu.memory_space<vmem>>, vector<1x1xf32>
      %95 = vector.broadcast %94 : vector<1x1xf32> to vector<8x1xf32>
      %96 = arith.addf %93, %95 : vector<8x1xf32>
      %97 = tpu.iota {dimensions = array<i32: 1>} : vector<8x2xi32>
      %98 = vector.broadcast %23 : vector<8x1xi32> to vector<8x2xi32>
      %99 = arith.cmpi eq, %97, %98 : vector<8x2xi32>
      %100 = arith.extui %99 : vector<8x2xi1> to vector<8x2xi32>
      %101 = arith.sitofp %100 : vector<8x2xi32> to vector<8x2xf32>
      %102 = vector.broadcast %96 : vector<8x1xf32> to vector<8x2xf32>
      %103 = arith.mulf %102, %101 : vector<8x2xf32>
      %cst_44 = arith.constant 1.000000e+00 : f32
      %104 = vector.broadcast %cst_44 : f32 to vector<8x2xf32>
      %105 = arith.subf %101, %104 : vector<8x2xf32>
      %cst_45 = arith.constant 1.000000e+30 : f32
      %106 = vector.broadcast %cst_45 : f32 to vector<8x2xf32>
      %107 = arith.mulf %105, %106 : vector<8x2xf32>
      %108 = arith.addf %103, %107 : vector<8x2xf32>
      %cst_46 = arith.constant dense<0xFF800000> : vector<2xf32>
      %109 = vector.multi_reduction <maximumf>, %108, %cst_46 [0] : vector<8x2xf32> to vector<2xf32>
      %110 = vector.shape_cast %109 : vector<2xf32> to vector<1x2xf32>
      %111 = vector.broadcast %110 : vector<1x2xf32> to vector<8x2xf32>
      %112 = arith.mulf %101, %111 : vector<8x2xf32>
      %cst_47 = arith.constant dense<0.000000e+00> : vector<8xf32>
      %113 = vector.multi_reduction <add>, %112, %cst_47 [1] : vector<8x2xf32> to vector<8xf32>
      %114 = vector.shape_cast %113 : vector<8xf32> to vector<8x1xf32>
      %115 = arith.subf %96, %114 : vector<8x1xf32>
      %116 = math.exp %115 : vector<8x1xf32>
      %117 = vector.broadcast %116 : vector<8x1xf32> to vector<8x2xf32>
      %118 = arith.mulf %101, %117 : vector<8x2xf32>
      %cst_48 = arith.constant dense<0.000000e+00> : vector<2xf32>
      %119 = vector.multi_reduction <add>, %118, %cst_48 [0] : vector<8x2xf32> to vector<2xf32>
      %120 = vector.shape_cast %119 : vector<2xf32> to vector<1x2xf32>
      %121 = vector.broadcast %120 : vector<1x2xf32> to vector<8x2xf32>
      %122 = arith.mulf %101, %121 : vector<8x2xf32>
      %cst_49 = arith.constant dense<0.000000e+00> : vector<8xf32>
      %123 = vector.multi_reduction <add>, %122, %cst_49 [1] : vector<8x2xf32> to vector<8xf32>
      %124 = vector.shape_cast %123 : vector<8xf32> to vector<8x1xf32>
      %125 = arith.divf %116, %124 : vector<8x1xf32>
      %126 = vector.broadcast %125 : vector<8x1xf32> to vector<8x32xf32>
      %127 = arith.mulf %126, %79 : vector<8x32xf32>
      %cst_50 = arith.constant dense<0.000000e+00> : vector<2x32xf32>
      %128 = tpu.matmul %101, %127, %cst_50 {dimension_numbers = #tpu.dot_dimension_numbers<[0], [0], [1], [1], [0, 1, 1, 1], [], []>} : vector<8x2xf32>, vector<8x32xf32>, vector<2x32xf32> -> vector<2x32xf32>
      %c0_51 = arith.constant 0 : index
      %c512_52 = arith.constant 512 : index
      %129 = vector.load %arg5[%c0_51, %c512_52] : memref<32x672xf32, #tpu.memory_space<vmem>>, vector<32x128xf32>
      %cst_53 = arith.constant dense<0.000000e+00> : vector<2x128xf32>
      %130 = tpu.matmul %128, %129, %cst_53 {dimension_numbers = #tpu.dot_dimension_numbers<[1], [0], [0], [1], [0, 0, 1, 1], [], []>} : vector<2x32xf32>, vector<32x128xf32>, vector<2x128xf32> -> vector<2x128xf32>
      %c0_54 = arith.constant 0 : index
      %c1280 = arith.constant 1280 : index
      %131 = vector.load %arg6[%c0_54, %c1280] : memref<1x1408xf32, #tpu.memory_space<vmem>>, vector<1x128xf32>
      %132 = vector.broadcast %131 : vector<1x128xf32> to vector<2x128xf32>
      %133 = arith.addf %130, %132 : vector<2x128xf32>
      %cst_55 = arith.constant dense<0xFF800000> : vector<8xf32>
      %134 = vector.multi_reduction <maximumf>, %88, %cst_55 [1] : vector<8x128xf32> to vector<8xf32>
      %135 = vector.shape_cast %134 : vector<8xf32> to vector<8x1xf32>
      %cst_56 = arith.constant dense<0xFF800000> : vector<1xf32>
      %136 = vector.multi_reduction <maximumf>, %135, %cst_56 [0] : vector<8x1xf32> to vector<1xf32>
      %137 = vector.shape_cast %136 : vector<1xf32> to vector<1x1xf32>
      %138 = vector.broadcast %137 : vector<1x1xf32> to vector<8x128xf32>
      %139 = arith.subf %88, %138 : vector<8x128xf32>
      %140 = math.exp %139 : vector<8x128xf32>
      %cst_57 = arith.constant dense<0.000000e+00> : vector<8xf32>
      %141 = vector.multi_reduction <add>, %140, %cst_57 [1] : vector<8x128xf32> to vector<8xf32>
      %142 = vector.shape_cast %141 : vector<8xf32> to vector<8x1xf32>
      %cst_58 = arith.constant dense<0.000000e+00> : vector<1xf32>
      %143 = vector.multi_reduction <add>, %142, %cst_58 [0] : vector<8x1xf32> to vector<1xf32>
      %144 = vector.shape_cast %143 : vector<1xf32> to vector<1x1xf32>
      %145 = vector.broadcast %144 : vector<1x1xf32> to vector<8x128xf32>
      %146 = arith.divf %140, %145 : vector<8x128xf32>
      %c0_59 = arith.constant 0 : index
      %c0_60 = arith.constant 0 : index
      %147 = vector.load %arg7[%c0_59, %c0_60] : memref<8x128xf32, #tpu.memory_space<vmem>>, vector<8x128xf32>
      tpu.vector_store %arg7[%c0_59, %c0_60], %146 {strides = array<i32>} : memref<8x128xf32, #tpu.memory_space<vmem>>, vector<8x128xf32>,
      %cst_61 = arith.constant dense<0xFF800000> : vector<2xf32>
      %148 = vector.multi_reduction <maximumf>, %133, %cst_61 [1] : vector<2x128xf32> to vector<2xf32>
      %149 = vector.shape_cast %148 : vector<2xf32> to vector<2x1xf32>
      %cst_62 = arith.constant dense<0xFF800000> : vector<1xf32>
      %150 = vector.multi_reduction <maximumf>, %149, %cst_62 [0] : vector<2x1xf32> to vector<1xf32>
      %151 = vector.shape_cast %150 : vector<1xf32> to vector<1x1xf32>
      %152 = vector.broadcast %151 : vector<1x1xf32> to vector<2x128xf32>
      %153 = arith.subf %133, %152 : vector<2x128xf32>
      %154 = math.exp %153 : vector<2x128xf32>
      %cst_63 = arith.constant dense<0.000000e+00> : vector<2xf32>
      %155 = vector.multi_reduction <add>, %154, %cst_63 [1] : vector<2x128xf32> to vector<2xf32>
      %156 = vector.shape_cast %155 : vector<2xf32> to vector<2x1xf32>
      %cst_64 = arith.constant dense<0.000000e+00> : vector<1xf32>
      %157 = vector.multi_reduction <add>, %156, %cst_64 [0] : vector<2x1xf32> to vector<1xf32>
      %158 = vector.shape_cast %157 : vector<1xf32> to vector<1x1xf32>
      %159 = vector.broadcast %158 : vector<1x1xf32> to vector<2x128xf32>
      %160 = arith.divf %154, %159 : vector<2x128xf32>
      %c0_65 = arith.constant 0 : index
      %c0_66 = arith.constant 0 : index
      %161 = vector.load %arg8[%c0_65, %c0_66] : memref<2x128xf32, #tpu.memory_space<vmem>>, vector<2x128xf32>
      tpu.vector_store %arg8[%c0_65, %c0_66], %160 {strides = array<i32>} : memref<2x128xf32, #tpu.memory_space<vmem>>, vector<2x128xf32>,
    } else {
    }
    return
  }
  func.func @transform_0(%arg0: i32) -> (i32, i32) {
    %c0_i32 = arith.constant 0 : i32
    %c0_i32_0 = arith.constant 0 : i32
    return %c0_i32, %arg0 : i32, i32
  }
  func.func @transform_1(%arg0: i32) -> (i32, i32) {
    %c0_i32 = arith.constant 0 : i32
    %c0_i32_0 = arith.constant 0 : i32
    return %arg0, %c0_i32 : i32, i32
  }
  func.func @transform_2(%arg0: i32) -> (i32, i32) {
    %c0_i32 = arith.constant 0 : i32
    %c0_i32_0 = arith.constant 0 : i32
    %c0_i32_1 = arith.constant 0 : i32
    return %c0_i32, %c0_i32_0 : i32, i32
  }
  func.func @transform_3(%arg0: i32) -> (i32, i32) {
    %c0_i32 = arith.constant 0 : i32
    %c0_i32_0 = arith.constant 0 : i32
    %c0_i32_1 = arith.constant 0 : i32
    return %c0_i32, %c0_i32_0 : i32, i32
  }
  func.func @transform_4(%arg0: i32) -> (i32, i32) {
    %c0_i32 = arith.constant 0 : i32
    %c0_i32_0 = arith.constant 0 : i32
    %c0_i32_1 = arith.constant 0 : i32
    return %c0_i32, %c0_i32_0 : i32, i32
  }
  func.func @transform_5(%arg0: i32) -> (i32, i32) {
    %c0_i32 = arith.constant 0 : i32
    %c0_i32_0 = arith.constant 0 : i32
    %c0_i32_1 = arith.constant 0 : i32
    return %c0_i32, %c0_i32_0 : i32, i32
  }
  func.func @transform_6(%arg0: i32) -> (i32, i32) {
    %c0_i32 = arith.constant 0 : i32
    %c0_i32_0 = arith.constant 0 : i32
    %c0_i32_1 = arith.constant 0 : i32
    return %c0_i32, %c0_i32_0 : i32, i32
  }
  func.func @transform_7(%arg0: i32) -> (i32, i32) {
    %c0_i32 = arith.constant 0 : i32
    %c0_i32_0 = arith.constant 0 : i32
    %c0_i32_1 = arith.constant 0 : i32
    return %c0_i32, %c0_i32_0 : i32, i32
  }
}

</mosaic_0001>

<bundles_post_ra>
// kernel: tpu_custom_call.1
= control target key start
LH: loop header
LB: loop body
LE: loop exit
PB: predicated region body
PF: predicated region fallthrough
CT: control target
= control target key end

     0   :  { %13 = vsyncpa [#allocation4], 0  ;;  %s2171_s0 = inlined_call_operand.vmem [shape: s32[1,256], index: 0, kind: input, shape index: {}]   ;;  %s2172_s1 = inlined_call_operand.vmem [shape: f32[256,28], index: 1, kind: input, shape index: {}]   ;;  %s2173_s2 = inlined_call_operand.vmem [shape: f32[28,32], index: 2, kind: input, shape index: {}]   ;;  %s2174_s3 = inlined_call_operand.vmem [shape: f32[8,34], index: 3, kind: input, shape index: {}]   ;;  %s2175_s4 = inlined_call_operand.vmem [shape: f32[32,672], index: 4, kind: input, shape index: {}]   ;;  %s2176_s5 = inlined_call_operand.vmem [shape: f32[1,1408], index: 5, kind: input, shape index: {}]   ;;  %s2177_s6 = inlined_call_operand.hbm [shape: f32[8,128], index: 6, kind: output, shape index: {0}]   ;;  %s2178_s7 = inlined_call_operand.hbm [shape: f32[2,128], index: 7, kind: output, shape index: {1}]  }
   0x1   :  { %14 = vsyncpa [#allocation6], 0  ;;  %s1879_s24 = smov 0  }
   0x2 LB: > { %s1885_s25 = sadd.s32 4294967295, %s1821_s24   ;;  %p1403_p0 = scmp.ge.s32.totalorder %s1821_s24, 1  ;;  %s1821_s24 = sphi %s1879_s24, %s20_s24  }
   0x3   : > { %p241_p1 = scmp.lt.s32.totalorder %s1821_s24, 3 }
   0x5   : > { %p242_p2 = pnand %p1403_p0, %p241_p1 }
   0x6   : > { %p271_p3 = scmp.lt.s32.totalorder (!%p242_p2), %s1885_s25, 1  ;;  %s1404_s26 = sshll.u32 (!%p242_p2), %s1885_s25, 4 }
   0x7   : > { %245 = sbr.rel (%p242_p2) target bundleno = 3295 (0xcdf), region = 44  ;;  %p275_p4 = scmp.lt.s32.totalorder (!%p242_p2), %s1404_s26, 31 }
   0x8   : > { %p1406_p5 = scmp.ne.s32.totalorder (!%p242_p2), %s1885_s25, 0 }
   0xe   : > { %s1892_s27 = scalar_select %p271_p3, %s1885_s25, 1 }
   0xf   : > { %s2180_s26 = smov (!%p275_p4, %s1404_s26), 31  ;;  %283 = sbr.rel (%p1406_p5) target bundleno = 22 (0x16), region = 48 }
  0x10   : > { %s273_s30 = scalar_lea.vmem %s2171_s0, %s1892_s27  ;;  %s1405_s8 = sshll.u32 %s2180_s26, 3  ;;  %vm284_vm0 = vcmask (!%p1406_p5), 261120   ;;  %v1823_v0 = vmov (!%p1406_p5), 0.0  }
  0x11   : > { %s1901_s11 = scalar_lea.vmem %s2172_s1, %s1405_s8  ;;  %285 = vst.msk [vmem:[#allocation2] sm:$0xff] (!%p1406_p5), %vm284_vm0, %v1823_v0 }
  0x16 PF: > { %v302_v1 = vld [vmem:[%s2173_s2] sm:$0xff]  ;;  %v303_v2 = vld [vmem:[%s2173_s2 + $0x8] sm:$0xff]  ;;  %v304_v3 = vld [vmem:[%s2173_s2 + $0x10] sm:$0xff]  ;;  %vm355_vm1 = vcmask 1043456   ;;  %vm306_vm2 = vcmask 228352   ;;  %vm1824_vm3 = vmmov 1   ;;  %v505_v44 = vlaneseq }
  0x17   : > { %v1627_v4 = vpack.c.bf16 %v303_v2, %v302_v1  ;;  %v305_v5 = vld [vmem:[%s2173_s2 + $0x18] sm:$0xf]  ;;  %v286_v6 = vld [vmem:[%s1901_s11] sm:$0xff]  ;;  %vm1632_vm4 = vmpackc.low %vm355_vm1, %vm1824_vm3  ;;  %v1825_v23 = vmov 0.0|0.0   ;;  %vm1826_vm5 = vmmov 0   ;;  %v1827_v24 = vmov 0.0  }
  0x18   : > { %v1631_v7 = vpack.c.bf16 %v305_v5, %v304_v3  ;;  %1519 = vmatprep.mubr.msk.f32.mxu0 %vm306_vm2, %v286_v6  ;;  %v287_v8 = vld [vmem:[%s1901_s11 + $0x8] sm:$0xff]  ;;  %v288_v9 = vld [vmem:[%s1901_s11 + $0x10] sm:$0xff]  ;;  %v289_v10 = vld [vmem:[%s1901_s11 + $0x18] sm:$0xff]  ;;  %1637 = vmatprep.subr.bf16.mxu1 %v1825_v23  ;;  %v1949_v48 = vshrl.u32 %v505_v44, 7  ;;  %v1828_v52 = vmov 1.0   ;;  %vm586_vm7 = vcmask 261120  }
  0x19   : > { %1628 = vmatprep.subr.bf16.mxu0 %v1627_v4  ;;  %v290_v11 = vld [vmem:[%s1901_s11 + $0x20] sm:$0xff]  ;;  %v291_v12 = vld [vmem:[%s1901_s11 + $0x28] sm:$0xff]  ;;  %v292_v13 = vld [vmem:[%s1901_s11 + $0x30] sm:$0xff]  ;;  %1575 = vmatprep.mubr.msk.f32.mxu1 %vm1826_vm5, %v1827_v24  ;;  %p1427_p6 = scmp.ne.s32.totalorder %s1885_s25, 1 }
  0x1a   : > { %1630 = vmatpush3.bf16.msra.mxu0 %v1627_v4  ;;  %v293_v14 = vld [vmem:[%s1901_s11 + $0x38] sm:$0xff]  ;;  %v294_v15 = vld [vmem:[%s1901_s11 + $0x40] sm:$0xff]  ;;  %v295_v16 = vld [vmem:[%s1901_s11 + $0x48] sm:$0xff]  ;;  %v1829_v60 = vmov (!%p1427_p6), 0.0|0.0   ;;  %vm1830_vm8 = vmmov (!%p1427_p6), 0   ;;  %v1831_v63 = vmov (!%p1427_p6), 0.0  }
  0x1b   : > { %1633 = vmatprep.subr.msk.bf16.mxu0 %vm1632_vm4, %v1631_v7  ;;  %v296_v17 = vld [vmem:[%s1901_s11 + $0x50] sm:$0xff]  ;;  %v297_v18 = vld [vmem:[%s1901_s11 + $0x58] sm:$0xff]  ;;  %v298_v19 = vld [vmem:[%s1901_s11 + $0x60] sm:$0xff]  ;;  %v1832_v2 = vmov (!%p1427_p6), 32   ;;  %s1833_s14 = smov (!%p1427_p6), 32   ;;  %s1834_s19 = smov (!%p1427_p6), 64  }
  0x1c   : > { %v299_v20 = vld [vmem:[%s1901_s11 + $0x68] sm:$0xff]  ;;  %v300_v21 = vld [vmem:[%s1901_s11 + $0x70] sm:$0xff]  ;;  %v301_v22 = vld [vmem:[%s1901_s11 + $0x78] sm:$0xff]  ;;  %1731 = vset.pattern.permute.xlu0 (!%p1427_p6), %v1832_v2  ;;  %vm1040_vm10 = vcmask (!%p1427_p6), 15360   ;;  %vm1116_vm11 = vcmask (!%p1427_p6), 64512   ;;  %vm1296_vm12 = vcmask (!%p1427_p6), 1041408  }
  0x1d   : > { %v1424_v50 = vld [vmem:[%s273_s30] ss:$0 sm:$0xff]  ;;  %v595_v57 = vld [vmem:[%s2175_s4 + $0x28] sm:$0xff] (!%p1427_p6)  ;;  %v596_v58 = vld [vmem:[%s2175_s4 + $0x58] sm:$0xff] (!%p1427_p6) }
  0x1e   : > { %1636 = vmatpush3.bf16.msk.msra.mxu0 %vm1632_vm4, %v1631_v7  ;;  %vm511_vm6 = vcmp.eq.s32.totalorder %v1949_v48, %v1424_v50  ;;  %v514_v53 = vld [vmem:[#allocation2] sm:$0xff]  ;;  %v597_v59 = vld [vmem:[%s2175_s4 + $0x88] sm:$0xff] (!%p1427_p6)  ;;  %v1662_v61 = vpack.c.bf16 (!%p1427_p6), %v596_v58, %v595_v57  ;;  %v598_v62 = vld [vmem:[%s2175_s4 + $0xb8] sm:$0xff] (!%p1427_p6) }
  0x1f   : > { %1661 = vmatprep.subr.bf16.mxu0 (!%p1427_p6), %v1829_v60  ;;  %v722_v0 = vld [vmem:[%s2175_s4 + $0x8] sm:$0xff] (!%p1427_p6)  ;;  %v1980_v1 = vld [vmem:[%s2174_s3] sm:$0xff] (!%p1427_p6)  ;;  %v723_v3 = vld [vmem:[%s2175_s4 + $0x38] sm:$0xff] (!%p1427_p6)  ;;  %v1665_v4 = vpack.c.bf16 (!%p1427_p6), %v598_v62, %v597_v59 }
  0x20   : > { %684 = vperm.xlu0 (!%p1427_p6), %1731, %v1980_v1   ;;  %v1668_v5 = vpack.c.bf16 (!%p1427_p6), %v723_v3, %v722_v0  ;;  %v718_v6 = vld [vmem:[%s2175_s4] sm:$0xff] (!%p1427_p6)  ;;  %v719_v7 = vld [vmem:[%s2175_s4 + $0x30] sm:$0xff] (!%p1427_p6)  ;;  %v915_v57 = vld [vmem:[%s2175_s4 + $0xa8] sm:$0xff] (!%p1427_p6) }
  0x21   : > { %1520 = vmatmul.mubr.msk.f32.vlgmr.msra.gmra.mrb[0].mxu0 %vm306_vm2, %v287_v8  ;;  %v1674_v8 = vpack.c.bf16 (!%p1427_p6), %v719_v7, %v718_v6  ;;  %v914_v62 = vld [vmem:[%s2175_s4 + $0xa0] sm:$0xff] (!%p1427_p6)  ;;  %v1693_v6 = vtrunc.f32 (!%p1427_p6), %v1980_v1 }
  0x22   : > { %1522 = vmatprep.mubr.msk.f32.mxu0 %vm306_vm2, %v288_v9  ;;  %1663 = vmatpush3.bf16.msra.mxu0 (!%p1427_p6), %v1662_v61  ;;  %v724_v9 = vld [vmem:[%s2175_s4 + $0x68] sm:$0xff] (!%p1427_p6)  ;;  %v912_v61 = vld [vmem:[%s2175_s4 + $0x70] sm:$0xff] (!%p1427_p6) }
  0x23   : > { %1664 = vmatprep.subr.bf16.mxu0 (!%p1427_p6), %v1829_v60  ;;  %v1685_v0 = vpack.c.bf16 (!%p1427_p6), %v914_v62, %v912_v61  ;;  %v1694_v7 = vcvt.f32.s32 (!%p1427_p6), %v1693_v6  ;;  %v1192_v61 = vld [vmem:[%s2175_s4 + $0x80] sm:$0xff] (!%p1427_p6) }
  0x25   : > { %1523 = vmatmul.mubr.msk.f32.gmra.mrb[2].mxu0 %vm306_vm2, %v289_v10  ;;  %v725_v10 = vld [vmem:[%s2175_s4 + $0x98] sm:$0xff] (!%p1427_p6) }
  0x26   : > { %1525 = vmatprep.mubr.msk.f32.mxu0 %vm306_vm2, %v290_v11  ;;  %1666 = vmatpush3.bf16.msra.mxu0 (!%p1427_p6), %v1665_v4  ;;  %v1671_v11 = vpack.c.bf16 (!%p1427_p6), %v725_v10, %v724_v9  ;;  %v920_v9 = vsub.s32 (!%p1427_p6), 0, %v1949_v48  ;;  %v2080_v10 = vld [vmem:[%s2176_s5 + $0x6] sm:$0x3] (!%p1427_p6) }
  0x27   : > { %1673 = vmatprep.subr.bf16.mxu0 (!%p1427_p6), %v1829_v60 }
  0x29   : > { %1526 = vmatmul.mubr.msk.f32.gmra.mrb[4].mxu0 %vm306_vm2, %v291_v12  ;;  %v720_v12 = vld [vmem:[%s2175_s4 + $0x60] sm:$0xff] (!%p1427_p6) }
  0x2a   : > { %1528 = vmatprep.mubr.msk.f32.mxu0 %vm306_vm2, %v292_v13  ;;  %v721_v13 = vld [vmem:[%s2175_s4 + $0x90] sm:$0xff] (!%p1427_p6) }
  0x2d   : > { %1529 = vmatmul.mubr.msk.f32.gmra.mrb[6].mxu0 %vm306_vm2, %v293_v14  ;;  %v1677_v14 = vpack.c.bf16 (!%p1427_p6), %v721_v13, %v720_v12 }
  0x2e   : > { %1531 = vmatprep.mubr.msk.f32.mxu0 %vm306_vm2, %v294_v15  ;;  %v1430_v15 = vld [vmem:[%s2176_s5 + $0x2] ss:$0 sm:$0xff] (!%p1427_p6) }
  0x31   : > { %1532 = vmatmul.mubr.msk.f32.gmra.mrb[8].mxu0 %vm306_vm2, %v295_v16  ;;  %v1432_v16 = vld [vmem:[%s2176_s5 + $0x4] ss:$0 sm:$0xff] (!%p1427_p6) }
  0x32   : > { %1534 = vmatprep.mubr.msk.f32.mxu0 %vm306_vm2, %v296_v17  ;;  %v1431_v17 = vld [vmem:[%s2176_s5 + $0x3] ss:$0 sm:$0xff] (!%p1427_p6) }
  0x35   : > { %1535 = vmatmul.mubr.msk.f32.gmra.mrb[10].mxu0 %vm306_vm2, %v297_v18 }
  0x36   : > { %1537 = vmatprep.mubr.msk.f32.mxu0 %vm306_vm2, %v298_v19  ;;  %v1433_v19 = vld [vmem:[%s2176_s5 + $0x5] ss:$0 sm:$0xff] (!%p1427_p6) }
  0x39   : > { %1538 = vmatmul.mubr.msk.f32.gmra.mrb[12].mxu0 %vm306_vm2, %v299_v20 }
  0x3a   : > { %1540 = vmatprep.mubr.msk.f32.mxu0 %vm306_vm2, %v300_v21 }
  0x3d   : > { %1541 = vmatmul.mubr.msk.f32.gmra.mrb[14].mxu0 %vm306_vm2, %v301_v22 }
  0x3e   : > { %1586 = vmatprep.mubr.msk.f32.mxu0 (!%p1427_p6), %vm1830_vm8, %v1831_v63 }
  0x9f   : > { %v685_v18 = vpop.permute.xlu0 (!%p1427_p6), %684 }
  0xa0   : > { %v693_v20 = vmul.f32 (!%p1427_p6), %v1430_v15, %v685_v18  ;;  %v709_v21 = vmul.f32 (!%p1427_p6), %v1432_v16, %v685_v18  ;;  %v1440_v18 = vld [vmem:[%s2176_s5 + $0x9] ss:$0 sm:$0xff] (!%p1427_p6) }
  0xa2   : > { %v701_v22 = vadd.f32 (!%p1427_p6), %v1431_v17, %v693_v20  ;;  %v1836_v17 = vmov (!%p1427_p6), 0  }
  0xa3   : > { %1734 = vset.pattern.permute.xlu0 (!%p1427_p6), %v1836_v17 }
  0xf4   : > { %v1521_v25 = vpop.f32.mrb[0].mxu0 }
  0xf5   : > { %v425_v26 = vpop.f32.mrb[1].mxu0  ;;  %1587 = vmatmul.mubr.msk.f32.vlgmr.msra.gmra.mrb[0].mxu0 (!%p1427_p6), %vm586_vm7, %v1980_v1  ;;  %v1439_v1 = vld [vmem:[%s2176_s5 + $0x8] ss:$0 sm:$0xff] (!%p1427_p6) }
  0xf6   : > { %v1638_v27 = vpack.c.bf16 %v1521_v25, %v425_v26  ;;  %1608 = vmatprep.mubr.msk.f32.mxu0 (!%p1427_p6), %vm1830_vm8, %v1831_v63  ;;  %1675 = vmatpush3.bf16.msra.mxu0 (!%p1427_p6), %v1674_v8  ;;  %v1429_v26 = vld [vmem:[%s2176_s5] ss:$0 sm:$0xff] (!%p1427_p6)  ;;  %v1835_v8 = vmov (!%p1427_p6), 33  }
  0xf7   : > { %1676 = vmatprep.subr.bf16.mxu0 (!%p1427_p6), %v1829_v60  ;;  %1732 = vset.pattern.permute.xlu1 (!%p1427_p6), %v1835_v8  ;;  %v1444_v8 = vld [vmem:[%s2176_s5 + $0xa] ss:$0 sm:$0xff] (!%p1427_p6) }
  0xf8   : > { %v1524_v28 = vpop.f32.mrb[2].mxu0  ;;  %1639 = vmatpush3.bf16.msra.mxu1 %v1638_v27 }
  0xf9   : > { %v435_v29 = vpop.f32.mrb[3].mxu0  ;;  %1640 = vmatprep.subr.bf16.mxu1 %v1825_v23 }
  0xfa   : > { %v1641_v30 = vpack.c.bf16 %v1524_v28, %v435_v29  ;;  %1678 = vmatpush3.bf16.msra.mxu0 (!%p1427_p6), %v1677_v14 }
  0xfb   : > { %1611 = vmatprep.subr.mxu0 (!%p1427_p6), %v1831_v63 }
  0xfc   : > { %v1527_v31 = vpop.f32.mrb[4].mxu0  ;;  %1642 = vmatpush3.bf16.msra.mxu1 %v1641_v30 }
  0xfd   : > { %v445_v32 = vpop.f32.mrb[5].mxu0  ;;  %1643 = vmatprep.subr.bf16.mxu1 %v1825_v23 }
  0xfe   : > { %v1644_v33 = vpack.c.bf16 %v1527_v31, %v445_v32 }
 0x100   : > { %v1530_v34 = vpop.f32.mrb[6].mxu0  ;;  %1645 = vmatpush3.bf16.msra.mxu1 %v1644_v33 }
 0x101   : > { %v455_v35 = vpop.f32.mrb[7].mxu0  ;;  %1646 = vmatprep.subr.bf16.mxu1 %v1825_v23 }
 0x102   : > { %v1647_v36 = vpack.c.bf16 %v1530_v34, %v455_v35  ;;  %v1436_v34 = vld [vmem:[%s2176_s5 + $0x1] ss:$0 sm:$0xff] (!%p1427_p6) }
 0x104   : > { %v1533_v37 = vpop.f32.mrb[8].mxu0  ;;  %1648 = vmatpush3.bf16.msra.mxu1 %v1647_v36 }
 0x105   : > { %v465_v38 = vpop.f32.mrb[9].mxu0  ;;  %1649 = vmatprep.subr.bf16.mxu1 %v1825_v23 }
 0x106   : > { %v1650_v39 = vpack.c.bf16 %v1533_v37, %v465_v38 }
 0x108   : > { %v1536_v40 = vpop.f32.mrb[10].mxu0  ;;  %1651 = vmatpush3.bf16.msra.mxu1 %v1650_v39 }
 0x109   : > { %v475_v41 = vpop.f32.mrb[11].mxu0  ;;  %1652 = vmatprep.subr.bf16.mxu1 %v1825_v23 }
 0x10a   : > { %v1653_v42 = vpack.c.bf16 %v1536_v40, %v475_v41 }
 0x10c   : > { %v1539_v43 = vpop.f32.mrb[12].mxu0  ;;  %1654 = vmatpush3.bf16.msra.mxu1 %v1653_v42 }
 0x10d   : > { %v485_v45 = vpop.f32.mrb[13].mxu0  ;;  %1655 = vmatprep.subr.bf16.mxu1 %v1825_v23 }
 0x10e   : > { %v1656_v46 = vpack.c.bf16 %v1539_v43, %v485_v45 }
 0x110   : > { %v1542_v47 = vpop.f32.mrb[14].mxu0  ;;  %1657 = vmatpush3.bf16.msra.mxu1 %v1656_v46 }
 0x111   : > { %v495_v49 = vpop.f32.mrb[15].mxu0  ;;  %1658 = vmatprep.subr.bf16.mxu1 %v1825_v23  ;;  %v717_v23 = vadd.f32 (!%p1427_p6), %v1433_v19, %v709_v21  ;;  %v1024_v21 = vand.u32 (!%p1427_p6), 127, %v505_v44 }
 0x112   : > { %v1659_v51 = vpack.c.bf16 %v1542_v47, %v495_v49 }
 0x113   : > { %888 = vrot.lane.b32.xlu1 (!%p1427_p6), %v717_v23, %s1833_s14 }
 0x114   : > { %1660 = vmatpush3.bf16.msra.mxu1 %v1659_v51  ;;  %v909_v51 = vld [vmem:[%s2175_s4 + $0x18] sm:$0xff] (!%p1427_p6) }
 0x115   : > { %1667 = vmatprep.subr.bf16.mxu1 (!%p1427_p6), %v1829_v60 }
 0x117   : > { %1576 = vmatmul.mubr.msk.f32.vlgmr.msra.gmra.mrb[0].mxu1 %vm511_vm6, %v1828_v52  ;;  %v911_v52 = vld [vmem:[%s2175_s4 + $0x48] sm:$0xff] (!%p1427_p6) }
 0x118   : > { %1597 = vmatprep.mubr.msk.f32.mxu1 (!%p1427_p6), %vm1830_vm8, %v1831_v63  ;;  %1669 = vmatpush3.bf16.msra.mxu1 (!%p1427_p6), %v1668_v5 }
 0x119   : > { %1670 = vmatprep.subr.bf16.mxu1 (!%p1427_p6), %v1829_v60 }
 0x11c   : > { %1672 = vmatpush3.bf16.msra.mxu1 (!%p1427_p6), %v1671_v11  ;;  %v921_v11 = vrot.slane (!%p1427_p6), %v2080_v10, %v920_v9 }
 0x185   : > { %v889_v46 = vpop.permute.xlu1 (!%p1427_p6), %888 }
 0x1c8   : > { %v668_v25 = vpop.f32.mrb[0].mxu0 (!%p1427_p6) }
 0x1c9   : > { %v1588_v28 = vpop.f32.mrb[1].mxu0 (!%p1427_p6) }
 0x1e7   : > { %591 = sbr.rel (%p1427_p6) target bundleno = 3247 (0xcaf), region = 52 }
 0x1ea   : > { %v581_v54 = vpop.f32.mrb[0].mxu1 }
 0x1eb   : > { %v585_v55 = vadd.f32 %v581_v54, %v514_v53  ;;  %v1577_v56 = vpop.f32.mrb[1].mxu1  ;;  %1598 = vmatmul.mubr.msk.f32.vlgmr.msra.gmra.mrb[0].mxu1 (!%p1427_p6), %vm586_vm7, %v701_v22  ;;  %v908_v53 = vld [vmem:[%s2175_s4 + $0x10] sm:$0xff] (!%p1427_p6)  ;;  %v1679_v54 = vpack.c.bf16 (!%p1427_p6), %v911_v52, %v909_v51 }
 0x1ec   : > { %997 = vmatprep.mubr.f32.mxu1 (!%p1427_p6), %v1831_v63  ;;  %v913_v56 = vld [vmem:[%s2175_s4 + $0x78] sm:$0xff] (!%p1427_p6) }
 0x1ed   : > { %587 = vst.msk [vmem:[#allocation2] sm:$0xff] %vm586_vm7, %v585_v55  ;;  %v910_v55 = vld [vmem:[%s2175_s4 + $0x40] sm:$0xff] (!%p1427_p6)  ;;  %v1683_v59 = vpack.c.bf16 (!%p1427_p6), %v915_v57, %v913_v56  ;;  %1680 = vmatprep.subr.bf16.mxu1 (!%p1427_p6), %v1679_v54 }
 0x1ee   : > { %v1681_v58 = vpack.c.bf16 %v910_v55, %v908_v53 }
 0x1f0   : > { %1682 = vmatpush1.bf16.msra.mxu1 %v1681_v58  ;;  %v1190_v58 = vld [vmem:[%s2175_s4 + $0x20] sm:$0xff] }
 0x1f1   : > { %1684 = vmatprep.subr.bf16.mxu1 %v1683_v59  ;;  %v1191_v59 = vld [vmem:[%s2175_s4 + $0x50] sm:$0xff] }
 0x1f2   : > { %v1688_v62 = vpack.c.bf16 %v1191_v59, %v1190_v58 }
 0x1f4   : > { %v594_v24 = vld [vmem:[#allocation2] sm:$0xff]  ;;  %1686 = vmatpush1.bf16.msra.mxu1 %v1685_v0  ;;  %v1193_v0 = vld [vmem:[%s2175_s4 + $0xb0] sm:$0xff] }
 0x1f5   : > { %v672_v27 = vadd.f32 %v668_v25, %v594_v24  ;;  %1687 = vmatprep.subr.bf16.mxu1 %v1829_v60 }
 0x1f7   : > { %v680_v29 = vadd.f32 %v1429_v26, %v672_v27 }
 0x1f9   : > { %v681_v30 = vmax.f32 %v680_v29, 0.0 }
 0x1fb   : > { %1609 = vmatmul.mubr.msk.f32.vlgmr.msra.gmra.mrb[2].mxu0 %vm586_vm7, %v681_v30 }
 0x1fc   : > { %1613 = vmatprep.mubr.msk.f32.mxu0 %vm1830_vm8, %v1831_v63 }
 0x2be   : > { %v795_v31 = vpop.f32.mrb[0].mxu1 }
 0x2bf   : > { %v1599_v32 = vpop.f32.mrb[1].mxu1 }
 0x2ce   : > { %v868_v33 = vpop.f32.mrb[2].mxu0 }
 0x2cf   : > { %v869_v35 = vadd.f32 %v868_v33, %v795_v31  ;;  %v1610_v36 = vpop.f32.mrb[3].mxu0 }
 0x2d1   : > { %v879_v37 = vadd.f32 %v1436_v34, %v869_v35 }
 0x2d3   : > { %1735 = vtanh.f32 %v879_v37  ;;  %v1437_v39 = vmul.f32 -1.442695, %v879_v37 }
 0x2d5   : > { %1737 = vpow2.f32 %v1437_v39 }
 0x2dd   : > { %v1736_v38 = vpop.eup %1735 }
 0x2de   : > { %893 = vrot.lane.b32.xlu0 %v1736_v38, %s1834_s19 }
 0x2df   : > { %v1738_v40 = vpop.eup %1737 }
 0x2e0   : > { %v883_v41 = vadd.f32 1.0, %v1738_v40 }
 0x2e2   : > { %1739 = vrcp.f32 %v883_v41 }
 0x2ec   : > { %v1740_v42 = vpop.eup %1739 }
 0x2ed   : > { %v891_v47 = vmul.f32 %v1740_v42, %v889_v46 }
 0x350   : > { %v894_v43 = vpop.permute.xlu0 %893 }
 0x351   : > { %v896_v45 = vmul.f32 %v1740_v42, %v894_v43 }
 0x353   : > { %898 = vrot.lane.b32.xlu1 %v896_v45, %s1833_s14 }
 0x3c5   : > { %v899_v49 = vpop.permute.xlu1 %898 }
 0x3c6   : > { %v901_v50 = vadd.f32 %v899_v49, %v891_v47 }
 0x3c8   : > { %1741 = vtanh.f32 %v901_v50 }
 0x3d2   : > { %v1742_v2 = vpop.eup %1741 }
 0x3d3   : > { %904 = vrot.lane.b32.xlu0 %v1742_v2, %s1834_s19  ;;  %v1691_v2 = vpack.c.bf16 %v1193_v0, %v1192_v61 }
 0x445   : > { %v905_v3 = vpop.permute.xlu0 %904 }
 0x446   : > { %v2068_v4 = vmul.f32 %v1740_v42, %v905_v3 }
 0x448   : > { %929 = vrot.lane.b32.xlu1 %v2068_v4, %s1833_s14 }
 0x44c   : > { %1026 = vperm.xlu1 %1732, %v1694_v7   ;;  %v924_v7 = vsub.s32 1, %v1949_v48 }
 0x450   : > { %1733 = vset.pattern.permute.xlu1 %v1836_v17 }
 0x4ba   : > { %v930_v5 = vpop.permute.xlu1 %929 }
 0x4bb   : > { %1438 = vmatmul.mubr.msk.f32.vlgmr.msra.gmra.mrb[2].mxu1 %vm586_vm7, %v930_v5 }
 0x4bc   : > { %1624 = vmatprep.mubr.msk.f32.mxu1 %vm1830_vm8, %v1831_v63  ;;  %1689 = vmatpush3.bf16.msra.mxu1 %v1688_v62 }
 0x4bd   : > { %1690 = vmatprep.subr.bf16.mxu1 %v1829_v60 }
 0x4c0   : > { %1692 = vmatpush3.bf16.msra.mxu1 %v1691_v2 }
 0x4cb   : > { %v1027_v22 = vpop.permute.xlu1 %1026 }
 0x4cc   : > { %vm1028_vm9 = vcmp.eq.s32.totalorder %v1024_v21, %v1027_v22 }
 0x4cd   : > { %v1441_v23 = vsel %vm1028_vm9, 1.0, %v1831_v63 }
 0x4ce   : > { %v1442_v24 = vadd.f32 -1.0, %v1441_v23 }
 0x4d0   : > { %v1038_v25 = vmul.f32 1e+30, %v1442_v24 }
 0x58e   : > { %v999_v12 = vpop.f32.mrb[2].mxu1 }
 0x58f   : > { %v1000_v13 = vadd.f32 %v999_v12, %v921_v11  ;;  %v2083_v14 = vpop.f32.mrb[3].mxu1  ;;  %v925_v12 = vrot.slane %v2080_v10, %v924_v7 }
 0x591   : > { %v1004_v15 = vmax.f32 %v1000_v13, 0.0 }
 0x593   : > { %v1012_v16 = vmul.f32 %v1439_v1, %v1004_v15  ;;  %v1002_v1 = vadd.f32 %v2083_v14, %v925_v12 }
 0x595   : > { %1013 = vadd.xlane.f32.xlu0 %v1012_v16 }
 0x622   : > { %v1014_v19 = vpop.xlane.xlu0 %1013 }
 0x623   : > { %v1022_v20 = vadd.f32 %v1440_v18, %v1014_v19 }
 0x625   : > { %1033 = vperm.xlu1 %1733, %v1022_v20  }
 0x6a4   : > { %v1034_v26 = vpop.permute.xlu1 %1033 }
 0x6a5   : > { %v1036_v27 = vmul.f32 %v1441_v23, %v1034_v26 }
 0x6a7   : > { %v1039_v28 = vadd.f32 %v1038_v25, %v1036_v27 }
 0x6a9   : > { %v1041_v29 = vsel %vm1040_vm10, %v1039_v28, -inf }
 0x6aa   : > { %v1042_v30 = vrot.slane %v1041_v29, 4 }
 0x6ac   : > { %v1043_v31 = vmax.f32 %v1041_v29, %v1042_v30 }
 0x6ae   : > { %v1044_v32 = vrot.slane %v1043_v31, 2 }
 0x6b0   : > { %v1045_v33 = vmax.f32 %v1043_v31, %v1044_v32 }
 0x6b2   : > { %v1046_v34 = vrot.slane %v1045_v33, 1 }
 0x6b4   : > { %v1047_v35 = vmax.f32 %v1045_v33, %v1046_v34 }
 0x6b6   : > { %v1048_v36 = vmul.f32 %v1441_v23, %v1047_v35 }
 0x6b8   : > { %v1049_v44 = vsel %vm1040_vm10, %v1048_v36, 0.0 }
 0x6b9   : > { %1050 = vadd.xlane.f32.xlu1 %v1049_v44 }
 0x746   : > { %v1051_v37 = vpop.xlane.xlu1 %1050 }
 0x747   : > { %v1052_v63 = vsub.f32 %v1022_v20, %v1051_v37 }
 0x749   : > { %v1053_v38 = vmul.f32 1.442695, %v1052_v63 }
 0x74b   : > { %1743 = vpow2.f32 %v1053_v38 }
 0x755   : > { %v1744_v39 = vpop.eup %1743 }
 0x756   : > { %1057 = vperm.xlu0 %1734, %v1744_v39  }
 0x7d5   : > { %v1058_v40 = vpop.permute.xlu0 %1057 }
 0x7d6   : > { %v1060_v41 = vmul.f32 %v1441_v23, %v1058_v40 }
 0x7d8   : > { %v1061_v42 = vsel %vm1040_vm10, %v1060_v41, 0.0 }
 0x7d9   : > { %v1062_v43 = vrot.slane %v1061_v42, 4 }
 0x7db   : > { %v1063_v45 = vadd.f32 %v1062_v43, %v1061_v42 }
 0x7dd   : > { %v1064_v46 = vrot.slane %v1063_v45, 2 }
 0x7df   : > { %v1065_v47 = vadd.f32 %v1064_v46, %v1063_v45 }
 0x7e1   : > { %v1066_v49 = vrot.slane %v1065_v47, 1 }
 0x7e3   : > { %v1067_v50 = vadd.f32 %v1066_v49, %v1065_v47 }
 0x7e5   : > { %v1068_v51 = vmul.f32 %v1441_v23, %v1067_v50 }
 0x7e7   : > { %v1069_v52 = vsel %vm1040_vm10, %v1068_v51, 0.0 }
 0x7e8   : > { %1070 = vadd.xlane.f32.xlu1 %v1069_v52 }
 0x875   : > { %v1071_v53 = vpop.xlane.xlu1 %1070 }
 0x876   : > { %1745 = vrcp.f32 %v1071_v53 }
 0x880   : > { %v1746_v54 = vpop.eup %1745 }
 0x881   : > { %v1073_v55 = vmul.f32 %v1746_v54, %v1744_v39 }
 0x883   : > { %1076 = vperm.xlu1 %1733, %v1073_v55  }
 0x902   : > { %v1077_v56 = vpop.permute.xlu1 %1076 }
 0x903   : > { %v1079_v57 = vmul.f32 %v1077_v56, %v2068_v4 }
 0x905   : > { %1113 = vrot.lane.b32.xlu1 %v1079_v57, %s1833_s14 }
 0x92e   : > { %1080 = vxpose.xlu1.b32.start.end [1/1] (short) (narrow) %v1441_v23, 8 }
 0x977   : > { %v1114_v3 = vpop.permute.xlu1 %1113 }
 0x978   : > { %1612 = vmatpush3.msra.mxu0 %v1114_v3 }
 0x9ae   : > { %v1096_v4 = vpop.trf.xlu1 }
 0x9af   : > { %1614 = vmatmul.mubr.msk.f32.vlgmr.msra.gmra.mrb[4].mxu0 %vm1116_vm11, %v1096_v4 }
 0xa82   : > { %v1186_v5 = vpop.f32.mrb[4].mxu0 }
 0xa83   : > { %v1615_v6 = vpop.f32.mrb[5].mxu0  ;;  %1625 = vmatmul.mubr.msk.f32.vlgmr.msra.gmra.mrb[4].mxu1 %vm586_vm7, %v1186_v5 }
 0xb56   : > { %v1270_v9 = vpop.f32.mrb[4].mxu1 }
 0xb57   : > { %v1271_v11 = vadd.f32 %v1444_v8, %v1270_v9  ;;  %v1626_v60 = vpop.f32.mrb[5].mxu1 }
 0xb59   : > { %v1297_v13 = vsel %vm1296_vm12, %v1271_v11, -inf }
 0xb5a   : > { %1298 = vmax.xlane.f32.xlu0 %v1297_v13 }
 0xb5e   : > { %1274 = vmax.xlane.f32.xlu0 %v1002_v1 }
 0xbe7   : > { %v1299_v15 = vpop.xlane.xlu0 %1298 }
 0xbe8   : > { %v1300_v16 = vsel %vm1296_vm12, %v1299_v15, -inf }
 0xbe9   : > { %v1301_v48 = vrot.slane %v1300_v16, 4 }
 0xbeb   : > { %v1302_v17 = vmax.f32 %v1300_v16, %v1301_v48  ;;  %v1275_v18 = vpop.xlane.xlu0 %1274 }
 0xbec   : > { %v1276_v19 = vrot.slane %v1275_v18, 4 }
 0xbed   : > { %v1303_v20 = vrot.slane %v1302_v17, 2 }
 0xbee   : > { %v1277_v21 = vmax.f32 %v1275_v18, %v1276_v19 }
 0xbef   : > { %v1304_v22 = vmax.f32 %v1302_v17, %v1303_v20 }
 0xbf0   : > { %v1278_v23 = vrot.slane %v1277_v21, 2 }
 0xbf1   : > { %v1305_v24 = vrot.slane %v1304_v22, 1 }
 0xbf2   : > { %v1279_v25 = vmax.f32 %v1277_v21, %v1278_v23 }
 0xbf3   : > { %v1306_v10 = vmax.f32 %v1304_v22, %v1305_v24 }
 0xbf4   : > { %v1280_v26 = vrot.slane %v1279_v25, 1 }
 0xbf5   : > { %v1307_v27 = vsub.f32 %v1271_v11, %v1306_v10 }
 0xbf6   : > { %v1281_v28 = vmax.f32 %v1279_v25, %v1280_v26 }
 0xbf7   : > { %v1308_v29 = vmul.f32 1.442695, %v1307_v27 }
 0xbf8   : > { %v1282_v14 = vsub.f32 %v1002_v1, %v1281_v28 }
 0xbf9   : > { %1747 = vpow2.f32 %v1308_v29 }
 0xbfa   : > { %v1283_v30 = vmul.f32 1.442695, %v1282_v14 }
 0xbfc   : > { %1749 = vpow2.f32 %v1283_v30 }
 0xc03   : > { %v1748_v31 = vpop.eup %1747 }
 0xc04   : > { %v1310_v32 = vsel %vm1296_vm12, %v1748_v31, 0.0 }
 0xc05   : > { %1311 = vadd.xlane.f32.xlu0 %v1310_v32 }
 0xc06   : > { %v1750_v33 = vpop.eup %1749 }
 0xc07   : > { %1285 = vadd.xlane.f32.xlu1 %v1750_v33 }
 0xc92   : > { %v1312_v34 = vpop.xlane.xlu0 %1311 }
 0xc93   : > { %v1313_v35 = vsel %vm1296_vm12, %v1312_v34, 0.0 }
 0xc94   : > { %v1314_v36 = vrot.slane %v1313_v35, 4  ;;  %v1286_v44 = vpop.xlane.xlu1 %1285 }
 0xc95   : > { %v1287_v37 = vrot.slane %v1286_v44, 4 }
 0xc96   : > { %v1315_v63 = vadd.f32 %v1314_v36, %v1313_v35 }
 0xc97   : > { %v1288_v38 = vadd.f32 %v1287_v37, %v1286_v44 }
 0xc98   : > { %v1316_v39 = vrot.slane %v1315_v63, 2 }
 0xc99   : > { %v1289_v40 = vrot.slane %v1288_v38, 2 }
 0xc9a   : > { %v1317_v41 = vadd.f32 %v1316_v39, %v1315_v63 }
 0xc9b   : > { %v1290_v42 = vadd.f32 %v1289_v40, %v1288_v38 }
 0xc9c   : > { %v1318_v43 = vrot.slane %v1317_v41, 1 }
 0xc9d   : > { %v1291_v45 = vrot.slane %v1290_v42, 1 }
 0xc9e   : > { %v1319_v46 = vadd.f32 %v1318_v43, %v1317_v41 }
 0xc9f   : > { %v1292_v47 = vadd.f32 %v1291_v45, %v1290_v42 }
 0xca0   : > { %1751 = vrcp.f32 %v1319_v46 }
 0xca1   : > { %1753 = vrcp.f32 %v1292_v47 }
 0xcaa   : > { %v1752_v49 = vpop.eup %1751 }
 0xcab   : > { %v1754_v50 = vpop.eup %1753  ;;  %v1321_v51 = vmul.f32 %v1752_v49, %v1748_v31 }
 0xcac   : > { %v1294_v52 = vmul.f32 %v1754_v50, %v1750_v33 }
 0xcad   : > { %1322 = vst [vmem:[#allocation5] sm:$0x3] %v1321_v51 }
 0xcae   : > { %1295 = vst [vmem:[#allocation3] sm:$0xff] %v1294_v52 }
 0xcaf PF: > { %p1703_p7 = scmp.eq.s32.totalorder %s1885_s25, 1  ;;  %s1837_s10 = smov [#allocation3]  }
 0xcb0   : > { %s1330_s11 = sshll.u32 %s1837_s10, 4  ;;  %s1838_s12 = smov [#allocation5]   ;;  %s1331_s11 = int_to_ptr.vmem [resolvable:$true] %s1330_s11 }
 0xcb1   : > { %s1341_s13 = sshll.u32 %s1838_s12, 4  ;;  %s1755_s15 = scalar_lea.vmem %s1331_s11, 128  ;;  %s1342_s13 = int_to_ptr.vmem [resolvable:$true] %s1341_s13 }
 0xcb2   : > { %p1756_p8 = scmp.ne.s32.totalorder %s1331_s11, %s1755_s15  ;;  %p1762_p11 = scmp.lt.s32.totalorder %s1331_s11, %s1331_s11 }
 0xcb3   : > { %p1763_p12 = scmp.lt.s32.totalorder %s1755_s15, %s1755_s15 }
 0xcb4   : > { %p1757_p9 = pnand %p1756_p8, %p1703_p7 }
 0xcb5   : > { %p1764_p13 = por %p1763_p12, %p1762_p11 }
 0xcb6   : > { %p1758_p10 = pneg %p1757_p9 }
 0xcb8   : > { %p1765_p0 = pnand %p1764_p13, %p1758_p10 }
 0xcba   : > { %1768 = shalt.err (!%p1765_p0)
}
 0xcbb   : > { %s1769_s18 = scalar_lea.hbm %s2177_s6, 128 }
 0xcbc   : > { %p1770_p1 = scmp.ne.s32.totalorder %s2177_s6, %s1769_s18  ;;  %p1775_p4 = scmp.lt.u32.totalorder %s1769_s18, %s2177_s6 }
 0xcbe   : > { %p1771_p2 = pnand %p1770_p1, %p1703_p7 }
 0xcc0   : > { %p1772_p3 = pneg %p1771_p2 }
 0xcc2   : > { %p1777_p5 = pnand %p1775_p4, %p1772_p3 }
 0xcc4   : > { %1780 = shalt.err (!%p1777_p5)
}
 0xcc5   : > { %1696 = dma.vmem_to_hbm [thread:$0]  (%p1703_p7), %s1331_s11, 128, %s2177_s6, [#allocation4]  }
 0xcc6   : > { %s1781_s27 = scalar_lea.vmem %s1342_s13, 32  ;;  %p1788_p10 = scmp.lt.s32.totalorder %s1342_s13, %s1342_s13 }
 0xcc7   : > { %p1782_p6 = scmp.ne.s32.totalorder %s1342_s13, %s1781_s27  ;;  %p1789_p11 = scmp.lt.s32.totalorder %s1781_s27, %s1781_s27 }
 0xcc9   : > { %p1783_p8 = pnand %p1782_p6, %p1703_p7  ;;  %p1790_p12 = por %p1789_p11, %p1788_p10 }
 0xccb   : > { %p1784_p9 = pneg %p1783_p8 }
 0xccd   : > { %p1791_p13 = pnand %p1790_p12, %p1784_p9 }
 0xccf   : > { %1794 = shalt.err (!%p1791_p13)
}
 0xcd0   : > { %s1795_s30 = scalar_lea.hbm %s2178_s7, 32 }
 0xcd1   : > { %p1796_p0 = scmp.ne.s32.totalorder %s2178_s7, %s1795_s30  ;;  %p1801_p3 = scmp.lt.u32.totalorder %s1795_s30, %s2178_s7 }
 0xcd3   : > { %p1797_p1 = pnand %p1796_p0, %p1703_p7 }
 0xcd5   : > { %p1798_p2 = pneg %p1797_p1 }
 0xcd7   : > { %p1803_p4 = pnand %p1801_p3, %p1798_p2 }
 0xcd9   : > { %1806 = shalt.err (!%p1803_p4)
}
 0xcda   : > { %1698 = dma.vmem_to_hbm [thread:$0]  (%p1703_p7), %s1342_s13, 32, %s2178_s7, [#allocation6]  }
 0xcdb   : > { %1812 = dma.done.wait (%p1703_p7), [#allocation4], 128  }
 0xcdc   : > { %1814 = vsyncadd (%p1703_p7), [#allocation4], 4294967168 }
 0xcdd   : > { %1816 = dma.done.wait (%p1703_p7), [#allocation6], 32  }
 0xcde   : > { %1818 = vsyncadd (%p1703_p7), [#allocation6], 4294967264 }
 0xcdf PF: > { %s20_s24 = sadd.s32 1, %s1821_s24  }
 0xce0   : > { %p17_p5 = scmp.ge.s32.totalorder %s20_s24, 4  }
 0xce2   :  { %19 = sbr.rel (!%p17_p5) target bundleno = 2 (0x2), region = 90 }
 0xce9   :  { %1358 = vsyncpa [#allocation4], 1 }
 0xcea   :  { %1360 = vsyncpa [#allocation4 + $0x1], 1 }
 0xceb   :  { %1361 = vsyncpa [#allocation6], 1 }

</bundles_post_ra>
